<compile_context>
chip_gen: v7x
topology: tpu7x:2x2x1
jax: 0.10.0
libtpu: 0.0.40
codegen_flags: <defaults>
</compile_context>

<pallas_src>
import jax
import jax.numpy as jnp
from jax import lax
from jax.experimental import pallas as pl
from jax.experimental.pallas import tpu as pltpu

SOS_ID = 1


def _default_vmem_limit():
    # ~3/4 of physical VMEM: ~96 MiB on v5e/v6e (128 MiB), ~48 MiB on v7x (64 MiB).
    try:
        cap = int(pltpu.get_tpu_info().vmem_capacity_bytes)
    except Exception:
        cap = 64 * 1024 * 1024
    return int(min(cap * 3 // 4, 100 * 1024 * 1024))


VMEM_LIMIT = _default_vmem_limit()


def _pick_t_block(T):
    # Cap the unrolled time block; stream longer sequences via the "arbitrary" axis.
    return 16 if (T > 16 and T % 16 == 0) else T


def _pick_n_block(N):
    # Split the batch across v7x's 2 TensorCores when cleanly possible (multiple of 8).
    return N // 2 if (N % 16 == 0) else N


# ----------------------------------------------------------------------------
# Kernel 1: one big MXU matmul + bias (hoists the GRU input gates); bf16 output.
# ----------------------------------------------------------------------------
def matmul_bias_kernel(x_ref, w_ref, b_ref, o_ref):
    acc = jnp.dot(x_ref[...], w_ref[...],
                  preferred_element_type=jnp.float32) + b_ref[...]
    o_ref[...] = acc.astype(o_ref.dtype)


def matmul_bias(x_bf16, w_bf16, b_f32, out_dtype=jnp.bfloat16, m_block=None):
    """(M,K)bf16 @ (K,N)bf16 + (1,N)f32 -> (M,N)out_dtype, row-blocked ('parallel')."""
    M, K = x_bf16.shape
    N = w_bf16.shape[1]
    mb = M if m_block is None else m_block
    assert M % mb == 0  # TODO(synk): add pl.cdiv + masking for non-divisible m_block.
    grid = (M // mb,)
    return pl.pallas_call(
        matmul_bias_kernel,
        out_shape=jax.ShapeDtypeStruct((M, N), out_dtype),
        grid=grid,
        in_specs=[pl.BlockSpec((mb, K), lambda i: (i, 0)),
                  pl.BlockSpec((K, N), lambda i: (0, 0)),
                  pl.BlockSpec((1, N), lambda i: (0, 0))],
        out_specs=pl.BlockSpec((mb, N), lambda i: (i, 0)),
        compiler_params=pltpu.CompilerParams(
            dimension_semantics=("parallel",), vmem_limit_bytes=VMEM_LIMIT),
    )(x_bf16, w_bf16, b_f32)


# ----------------------------------------------------------------------------
# GRU recurrence kernels (input gates precomputed in bf16), PyTorch gate order
# r,z,n.  Batch-major layout (N, T, ...); grid = (batch blocks ["parallel"],
# time blocks ["arbitrary"]); hidden persists in VMEM scratch across time blocks.
# ----------------------------------------------------------------------------
def _gru_gate_update(gi, h, whh_ref, bhh_ref):
    H = h.shape[-1]
    gh = jnp.dot(h.astype(jnp.bfloat16), whh_ref[...],
                 preferred_element_type=jnp.float32) + bhh_ref[...]
    r = jax.nn.sigmoid(gi[:, 0:H] + gh[:, 0:H])
    z = jax.nn.sigmoid(gi[:, H:2 * H] + gh[:, H:2 * H])
    n = jnp.tanh(gi[:, 2 * H:3 * H] + r * gh[:, 2 * H:3 * H])
    return (1.0 - z) * n + z * h


def gru_last_kernel(gi_ref, lens_ref, h0_ref, whh_ref, bhh_ref, last_ref, h_s):
    """GRU that only emits the masked output of the final time step (N, H)."""
    tb = gi_ref.shape[1]
    t_blk = pl.program_id(1)
    t0 = t_blk * tb

    @pl.when(t_blk == 0)
    def _():
        h_s[...] = h0_ref[...]

    lens = lens_ref[...]                                   # (nb, 1) int32

    for tt in range(tb):                                   # static unrolled block
        gi = gi_ref[:, tt].astype(jnp.float32)             # (nb, 3H)
        h = h_s[...]
        h_new = _gru_gate_update(gi, h, whh_ref, bhh_ref)
        valid = lens > (t0 + tt)
        h_s[...] = jnp.where(valid, h_new, h)              # carry old h past seq end

    @pl.when(t_blk == pl.num_programs(1) - 1)
    def _():
        t_last = pl.num_programs(1) * tb - 1
        # Matches pad_packed_sequence: the output at the last padded position is
        # zero for chunks shorter than the padded length.
        # TODO(synk): if "final valid hidden per chunk" is the intended semantics,
        # write h_s unmasked here instead.
        last_ref[...] = jnp.where(lens > t_last, h_s[...], 0.0)


def gru_full_kernel(gi_ref, lens_ref, h0_ref, whh_ref, bhh_ref,
                    out_ref, hfin_ref, h_s):
    """GRU emitting the full (N, T, H) output and the final hidden (N, H)."""
    tb = gi_ref.shape[1]
    t_blk = pl.program_id(1)
    t0 = t_blk * tb

    @pl.when(t_blk == 0)
    def _():
        h_s[...] = h0_ref[...]

    lens = lens_ref[...]

    for tt in range(tb):
        gi = gi_ref[:, tt].astype(jnp.float32)
        h = h_s[...]
        h_new = _gru_gate_update(gi, h, whh_ref, bhh_ref)
        valid = lens > (t0 + tt)
        h_next = jnp.where(valid, h_new, h)
        h_s[...] = h_next
        out_ref[:, tt] = jnp.where(valid, h_next, 0.0)     # packed-seq: padded out = 0

    @pl.when(t_blk == pl.num_programs(1) - 1)
    def _():
        hfin_ref[...] = h_s[...]


def _gru_specs(nb, tb, G, H):
    in_specs = [pl.BlockSpec((nb, tb, G), lambda n, t: (n, t, 0)),   # gi (bf16)
                pl.BlockSpec((nb, 1), lambda n, t: (n, 0)),          # lengths (int32)
                pl.BlockSpec((nb, H), lambda n, t: (n, 0)),          # h0
                pl.BlockSpec((H, G), lambda n, t: (0, 0)),           # W_hh
                pl.BlockSpec((1, G), lambda n, t: (0, 0))]           # b_hh
    return in_specs


def gru_last(gi_bf16, lens, h0, w_hh, b_hh, *, t_block=None, n_block=None):
    """gi_bf16: (N,T,3H) bf16, lens: (N,1) int32, h0: (N,H) f32 -> (N,H) f32."""
    N, T, G = gi_bf16.shape
    H = h0.shape[-1]
    tb = _pick_t_block(T) if t_block is None else t_block
    nb = _pick_n_block(N) if n_block is None else n_block
    assert T % tb == 0 and N % nb == 0  # TODO(synk): remainder handling for sweeps.
    grid = (N // nb, T // tb)
    return pl.pallas_call(
        gru_last_kernel,
        out_shape=jax.ShapeDtypeStruct((N, H), jnp.float32),
        grid=grid,
        in_specs=_gru_specs(nb, tb, G, H),
        out_specs=pl.BlockSpec((nb, H), lambda n, t: (n, 0)),
        scratch_shapes=[pltpu.VMEM((nb, H), jnp.float32)],
        compiler_params=pltpu.CompilerParams(
            dimension_semantics=("parallel", "arbitrary"),
            vmem_limit_bytes=VMEM_LIMIT),
    )(gi_bf16, lens, h0, w_hh, b_hh)


def gru_full(gi_bf16, lens, h0, w_hh, b_hh, *, t_block=None, n_block=None):
    """Returns (out (N,T,H) f32, final hidden (N,H) f32)."""
    N, T, G = gi_bf16.shape
    H = h0.shape[-1]
    tb = _pick_t_block(T) if t_block is None else t_block
    nb = _pick_n_block(N) if n_block is None else n_block
    assert T % tb == 0 and N % nb == 0  # TODO(synk): remainder handling for sweeps.
    grid = (N // nb, T // tb)
    return pl.pallas_call(
        gru_full_kernel,
        out_shape=(jax.ShapeDtypeStruct((N, T, H), jnp.float32),
                   jax.ShapeDtypeStruct((N, H), jnp.float32)),
        grid=grid,
        in_specs=_gru_specs(nb, tb, G, H),
        out_specs=(pl.BlockSpec((nb, tb, H), lambda n, t: (n, t, 0)),
                   pl.BlockSpec((nb, H), lambda n, t: (n, 0))),
        scratch_shapes=[pltpu.VMEM((nb, H), jnp.float32)],
        compiler_params=pltpu.CompilerParams(
            dimension_semantics=("parallel", "arbitrary"),
            vmem_limit_bytes=VMEM_LIMIT),
    )(gi_bf16, lens, h0, w_hh, b_hh)


# ----------------------------------------------------------------------------
# Kernel 3: fused greedy attention decoder.
# grid = (max_length,) "arbitrary"; weights + encoder outputs resident in VMEM,
# hidden state and next-token one-hot carried in VMEM scratch across steps.
# ----------------------------------------------------------------------------
def fused_decoder_kernel(h0_ref, enc_ref, embgi_ref, whh_ref, bih_ref, bhh_ref,
                         wattn_ref, battn_ref, wout_ref, bout_ref,
                         logp_ref, attn_ref, hfin_ref, h_s, onehot_s):
    t = pl.program_id(0)
    B, H = h0_ref.shape
    V = wout_ref.shape[1]
    iota_v = lax.broadcasted_iota(jnp.int32, (B, V), 1)

    @pl.when(t == 0)
    def _():
        h_s[...] = h0_ref[...]
        onehot_s[...] = (iota_v == SOS_ID).astype(jnp.float32)   # <SOS> input token

    # One-hot token -> input gates in ONE matmul (emb@W_ih pre-folded into embgi).
    # TODO(synk): at real vocab sizes replace the one-hot matmul with an indexed
    # single-row gather (argmax index in SMEM + DMA of one embgi row).
    gi = jnp.dot(onehot_s[...].astype(jnp.bfloat16), embgi_ref[...],
                 preferred_element_type=jnp.float32) + bih_ref[...]

    # GRU cell (r,z,n gate order)
    h = h_s[...]
    gh = jnp.dot(h.astype(jnp.bfloat16), whh_ref[...],
                 preferred_element_type=jnp.float32) + bhh_ref[...]
    r = jax.nn.sigmoid(gi[:, 0:H] + gh[:, 0:H])
    z = jax.nn.sigmoid(gi[:, H:2 * H] + gh[:, H:2 * H])
    n = jnp.tanh(gi[:, 2 * H:3 * H] + r * gh[:, 2 * H:3 * H])
    h_new = (1.0 - z) * n + z * h
    h_s[...] = h_new

    # Luong dot attention over chunk-level encoder outputs (bf16 resident).
    enc = enc_ref[...].astype(jnp.float32)                       # (B, S, H)
    scores = jnp.sum(h_new[:, None, :] * enc, axis=-1)           # (B, S) lane reduce
    scores = scores - jnp.max(scores, axis=-1, keepdims=True)
    e = jnp.exp(scores)
    p = e / jnp.sum(e, axis=-1, keepdims=True)                   # exact: rows sum to 1
    mix = jnp.sum(p[:, :, None] * enc, axis=1)                   # (B, H)

    # tanh(Linear(cat(mix, rnn_out))): single fused matmul, K = 2H fills the MXU.
    cat = jnp.concatenate([mix, h_new], axis=-1)                 # (B, 2H)
    ctx = jnp.tanh(jnp.dot(cat.astype(jnp.bfloat16), wattn_ref[...],
                           preferred_element_type=jnp.float32) + battn_ref[...])

    # output projection + log_softmax
    logits = jnp.dot(ctx.astype(jnp.bfloat16), wout_ref[...],
                     preferred_element_type=jnp.float32) + bout_ref[...]
    mx = jnp.max(logits, axis=-1, keepdims=True)
    s = logits - mx
    lse = jnp.log(jnp.sum(jnp.exp(s), axis=-1, keepdims=True))
    logp = s - lse

    # greedy argmax -> next-step one-hot input (first-max tie break == torch.argmax)
    first_idx = jnp.min(jnp.where(logits >= mx, iota_v, V), axis=-1, keepdims=True)
    onehot_s[...] = (iota_v == first_idx).astype(jnp.float32)

    logp_ref[0] = logp
    attn_ref[0] = p

    @pl.when(t == pl.num_programs(0) - 1)
    def _():
        hfin_ref[...] = h_s[...]


def fused_greedy_decoder(h0, enc_out_bf16, emb_gi, w_hh, b_ih, b_hh,
                         w_attn, b_attn, w_out, b_out, max_length):
    B, H = h0.shape
    S = enc_out_bf16.shape[1]
    V = w_out.shape[1]
    G = w_hh.shape[1]
    # TODO(synk): if V or H grow, tile the output projection over V and switch the
    # embedding to an indexed gather to stay inside v7x's 64 MiB VMEM.
    logp, attn, h_fin = pl.pallas_call(
        fused_decoder_kernel,
        out_shape=(jax.ShapeDtypeStruct((max_length, B, V), jnp.float32),
                   jax.ShapeDtypeStruct((max_length, B, S), jnp.float32),
                   jax.ShapeDtypeStruct((B, H), jnp.float32)),
        grid=(max_length,),
        in_specs=[pl.BlockSpec((B, H), lambda t: (0, 0)),          # init hidden
                  pl.BlockSpec((B, S, H), lambda t: (0, 0, 0)),    # hrnn outputs (bf16)
                  pl.BlockSpec((V, G), lambda t: (0, 0)),          # dec_emb @ W_ih
                  pl.BlockSpec((H, G), lambda t: (0, 0)),          # dec W_hh
                  pl.BlockSpec((1, G), lambda t: (0, 0)),          # dec b_ih
                  pl.BlockSpec((1, G), lambda t: (0, 0)),          # dec b_hh
                  pl.BlockSpec((2 * H, H), lambda t: (0, 0)),      # attn [W_mix;W_dec]
                  pl.BlockSpec((1, H), lambda t: (0, 0)),          # attn b
                  pl.BlockSpec((H, V), lambda t: (0, 0)),          # out W
                  pl.BlockSpec((1, V), lambda t: (0, 0))],         # out b
        out_specs=(pl.BlockSpec((1, B, V), lambda t: (t, 0, 0)),
                   pl.BlockSpec((1, B, S), lambda t: (t, 0, 0)),
                   pl.BlockSpec((B, H), lambda t: (0, 0))),
        scratch_shapes=[pltpu.VMEM((B, H), jnp.float32),
                        pltpu.VMEM((B, V), jnp.float32)],
        compiler_params=pltpu.CompilerParams(
            dimension_semantics=("arbitrary",), vmem_limit_bytes=VMEM_LIMIT),
    )(h0, enc_out_bf16, emb_gi, w_hh, b_ih, b_hh, w_attn, b_attn, w_out, b_out)
    return logp, attn, h_fin


# ----------------------------------------------------------------------------
# Parameters (deterministic, synthetic); matmul weights in bf16, biases in f32
# ----------------------------------------------------------------------------
def init_params(key, vocab_in, vocab_out, H):
    ks = jax.random.split(key, 19)

    def w(k, shape, scale=0.1, dtype=jnp.bfloat16):
        return (scale * jax.random.normal(k, shape)).astype(dtype)

    f32 = jnp.float32
    return {
        'enc_emb': w(ks[0], (vocab_in, H)),
        'enc_w_ih': w(ks[1], (H, 3 * H)), 'enc_w_hh': w(ks[2], (H, 3 * H)),
        'enc_b_ih': w(ks[3], (1, 3 * H), dtype=f32), 'enc_b_hh': w(ks[4], (1, 3 * H), dtype=f32),
        'hrnn_w_ih': w(ks[5], (H, 3 * H)), 'hrnn_w_hh': w(ks[6], (H, 3 * H)),
        'hrnn_b_ih': w(ks[7], (1, 3 * H), dtype=f32), 'hrnn_b_hh': w(ks[8], (1, 3 * H), dtype=f32),
        'dec_emb': w(ks[9], (vocab_out, H)),
        'dec_w_ih': w(ks[10], (H, 3 * H)), 'dec_w_hh': w(ks[11], (H, 3 * H)),
        'dec_b_ih': w(ks[12], (1, 3 * H), dtype=f32), 'dec_b_hh': w(ks[13], (1, 3 * H), dtype=f32),
        'attn_w_mix': w(ks[14], (H, H)), 'attn_w_dec': w(ks[15], (H, H)),
        'attn_b': w(ks[16], (1, H), dtype=f32),
        'out_w': w(ks[17], (H, vocab_out)), 'out_b': w(ks[18], (1, vocab_out), dtype=f32),
    }


# ----------------------------------------------------------------------------
# HSeq2seq.forward
# ----------------------------------------------------------------------------
def hseq2seq_forward(params, input_variable, input_lengths=None, chunk_lengths=None,
                     target_variable=None, teacher_forcing_ratio=0):
    B, S, C = input_variable.shape
    H = params['enc_w_hh'].shape[0]

    # The reference sorts chunks by length only for pack_padded_sequence and unsorts
    # right after; the masked GRU runs all C steps regardless, so sort/unsort is
    # dropped (pure overhead: 2 argsorts + 2 gathers).
    flat_input = input_variable.reshape(-1, C)                    # (B*S, C)
    flat_lens = chunk_lengths.reshape(-1, 1).astype(jnp.int32)    # (B*S, 1)

    # --- word-level encoder GRU over each chunk ---
    emb = jnp.take(params['enc_emb'], flat_input, axis=0)         # (B*S, C, H) bf16
    # Hoisted input-gate matmul: one big MXU matmul over all (B*S*C) tokens; bf16 out.
    gi_flat = matmul_bias(emb.reshape(-1, H), params['enc_w_ih'], params['enc_b_ih'])
    gi = gi_flat.reshape(B * S, C, 3 * H)                         # batch-major, bf16
    h0 = jnp.zeros((B * S, H), jnp.float32)
    # Only the last-step (masked) output is consumed downstream -> skip writing the
    # full (N, C, H) encoder output tensor.
    last_out = gru_last(gi, flat_lens, h0, params['enc_w_hh'], params['enc_b_hh'])
    last_outputs = last_out.reshape(B, S, H)                      # (B, S, H)
    # TODO(synk): HRNN class not provided; its attention over the full word-level
    # outputs is not modeled (use gru_full on the word encoder if it is ever needed).

    # --- chunk-level hierarchical GRU ---
    gi2_flat = matmul_bias(last_outputs.astype(jnp.bfloat16).reshape(-1, H),
                           params['hrnn_w_ih'], params['hrnn_b_ih'])
    gi2 = gi2_flat.reshape(B, S, 3 * H)                           # batch-major, bf16
    lens2 = jnp.full((B, 1), S, jnp.int32)                        # sequence lengths = S
    hrnn_outputs, hrnn_hidden = gru_full(
        gi2, lens2, jnp.zeros((B, H), jnp.float32),
        params['hrnn_w_hh'], params['hrnn_b_hh'])                 # (B,S,H), (B,H)

    # --- decoder precomputes (one-time): fold dec_emb @ W_ih, concat attn weights ---
    emb_gi = jnp.dot(params['dec_emb'].astype(jnp.float32),
                     params['dec_w_ih'].astype(jnp.float32)).astype(jnp.bfloat16)
    w_attn = jnp.concatenate([params['attn_w_mix'], params['attn_w_dec']], axis=0)

    # --- fused greedy attention decoder (teacher_forcing_ratio = 0) ---
    if target_variable is not None:
        max_length = int(target_variable.shape[1]) - 1
    else:
        max_length = 5

    logp_all, attn_all, hidden_fin = fused_greedy_decoder(
        hrnn_hidden, hrnn_outputs.astype(jnp.bfloat16), emb_gi,
        params['dec_w_hh'], params['dec_b_ih'], params['dec_b_hh'],
        w_attn, params['attn_b'], params['out_w'], params['out_b'], max_length)

    seq_all = jnp.argmax(logp_all, axis=-1).astype(jnp.int32)     # (L, B)

    decoder_outputs = [logp_all[t] for t in range(max_length)]
    sequences = [seq_all[t] for t in range(max_length)]
    attn_scores = [attn_all[t] for t in range(max_length)]

    decoder_hidden = hidden_fin[None]                             # (1, B, H)
    ret_dict = {
        'attention_score': attn_scores,
        'sequence': sequences,
        'length': [max_length] * B,
        'inputs': target_variable,
    }
    return decoder_outputs, decoder_hidden, ret_dict


# ----------------------------------------------------------------------------
if __name__ == "__main__":
    B, S, C = 2, 4, 8          # batch, chunks per sequence, tokens per chunk
    H = 128                    # hidden size (lane-dense: multiple of 128)
    VOCAB_IN, VOCAB_OUT = 256, 256
    T_TGT = 6

    key = jax.random.PRNGKey(0)
    k_inp, k_len, k_tgt, k_par = jax.random.split(key, 4)

    input_variable = jax.random.randint(k_inp, (B, S, C), 0, VOCAB_IN, dtype=jnp.int32)
    chunk_lengths = jax.random.randint(k_len, (B, S), 4, C + 1, dtype=jnp.int32)
    target_variable = jax.random.randint(k_tgt, (B, T_TGT), 0, VOCAB_OUT, dtype=jnp.int32)

    params = init_params(k_par, VOCAB_IN, VOCAB_OUT, H)

    decoder_outputs, decoder_hidden, ret_dict = hseq2seq_forward(
        params, input_variable, input_lengths=None, chunk_lengths=chunk_lengths,
        target_variable=target_variable, teacher_forcing_ratio=0)

    jax.block_until_ready(decoder_outputs[-1])
    jax.block_until_ready(decoder_hidden)
    assert decoder_outputs[-1].shape == (B, VOCAB_OUT)
    assert decoder_hidden.shape == (1, B, H)
    assert ret_dict['sequence'][-1].shape == (B,)
    print("KERNEL_OK")
</pallas_src>

<mosaic_0001>
module attributes {stable_mosaic.version = 11 : i64} {
  func.func @matmul_bias_kernel(%arg0: i32, %arg1: memref<64x128xbf16, #tpu.memory_space<vmem>>, %arg2: memref<128x384xbf16, #tpu.memory_space<vmem>>, %arg3: memref<1x384xf32, #tpu.memory_space<vmem>>, %arg4: memref<64x384xbf16, #tpu.memory_space<vmem>>) attributes {dimension_semantics = [#tpu.dimension_semantics<parallel>], iteration_bounds = array<i64: 1>, scalar_prefetch = 0 : i64, scratch_operands = 0 : i64, tpu.core_type = #tpu.core_type<tc>, window_params = [{transform_indices = @transform_0, window_bounds = array<i64: 64, 128>}, {pipeline_mode = #tpu.pipeline_mode<synchronous>, transform_indices = @transform_1, window_bounds = array<i64: 128, 384>}, {pipeline_mode = #tpu.pipeline_mode<synchronous>, transform_indices = @transform_2, window_bounds = array<i64: 1, 384>}, {transform_indices = @transform_3, window_bounds = array<i64: 64, 384>}]} {
    %c0 = arith.constant 0 : index
    %c0_0 = arith.constant 0 : index
    %0 = vector.load %arg1[%c0, %c0_0] : memref<64x128xbf16, #tpu.memory_space<vmem>>, vector<64x128xbf16>
    %c0_1 = arith.constant 0 : index
    %c0_2 = arith.constant 0 : index
    %1 = vector.load %arg2[%c0_1, %c0_2] : memref<128x384xbf16, #tpu.memory_space<vmem>>, vector<128x384xbf16>
    %cst = arith.constant dense<0.000000e+00> : vector<64x384xf32>
    %2 = tpu.matmul %0, %1, %cst {dimension_numbers = #tpu.dot_dimension_numbers<[1], [0], [0], [1], [0, 0, 1, 1], [], []>} : vector<64x128xbf16>, vector<128x384xbf16>, vector<64x384xf32> -> vector<64x384xf32>
    %c0_3 = arith.constant 0 : index
    %c0_4 = arith.constant 0 : index
    %3 = vector.load %arg3[%c0_3, %c0_4] : memref<1x384xf32, #tpu.memory_space<vmem>>, vector<1x384xf32>
    %4 = vector.broadcast %3 : vector<1x384xf32> to vector<64x384xf32>
    %5 = arith.addf %2, %4 : vector<64x384xf32>
    %6 = arith.truncf %5 : vector<64x384xf32> to vector<64x384xbf16>
    %c0_5 = arith.constant 0 : index
    %c0_6 = arith.constant 0 : index
    %7 = vector.load %arg4[%c0_5, %c0_6] : memref<64x384xbf16, #tpu.memory_space<vmem>>, vector<64x384xbf16>
    tpu.vector_store %arg4[%c0_5, %c0_6], %6 {strides = array<i32>} : memref<64x384xbf16, #tpu.memory_space<vmem>>, vector<64x384xbf16>,
    return
  }
  func.func @transform_0(%arg0: i32) -> (i32, i32) {
    %c0_i32 = arith.constant 0 : i32
    %c0_i32_0 = arith.constant 0 : i32
    return %arg0, %c0_i32 : i32, i32
  }
  func.func @transform_1(%arg0: i32) -> (i32, i32) {
    %c0_i32 = arith.constant 0 : i32
    %c0_i32_0 = arith.constant 0 : i32
    %c0_i32_1 = arith.constant 0 : i32
    return %c0_i32, %c0_i32_0 : i32, i32
  }
  func.func @transform_2(%arg0: i32) -> (i32, i32) {
    %c0_i32 = arith.constant 0 : i32
    %c0_i32_0 = arith.constant 0 : i32
    %c0_i32_1 = arith.constant 0 : i32
    return %c0_i32, %c0_i32_0 : i32, i32
  }
  func.func @transform_3(%arg0: i32) -> (i32, i32) {
    %c0_i32 = arith.constant 0 : i32
    %c0_i32_0 = arith.constant 0 : i32
    return %arg0, %c0_i32 : i32, i32
  }
}

</mosaic_0001>

<bundles_post_ra>
// kernel: tpu_custom_call.1
= control target key start
LH: loop header
LB: loop body
LE: loop exit
PB: predicated region body
PF: predicated region fallthrough
CT: control target
= control target key end

     0   :  { %8 = vsyncpa [#allocation3], 0  ;;  %s814_s0 = inlined_call_operand.hbm [shape: bf16[64,128], index: 0, kind: input, shape index: {}]   ;;  %s815_s1 = inlined_call_operand.hbm [shape: bf16[128,384], index: 1, kind: input, shape index: {}]   ;;  %s816_s2 = inlined_call_operand.vmem [shape: f32[1,384], index: 2, kind: input, shape index: {}]   ;;  %s817_s3 = inlined_call_operand.hbm [shape: bf16[64,384], index: 3, kind: output, shape index: {}]  }
   0x1   :  { %9 = vsyncpa [#allocation6], 0 }
   0x2   :  { %10 = vsyncpa [#allocation4], 0  ;;  %s717_s12 = smov [#allocation2]   ;;  %s645_s16 = scalar_lea.hbm %s814_s0, 512 }
   0x3   :  { %s16_s13 = sshll.u32 %s717_s12, 4  ;;  %p646_p0 = scmp.ne.s32.totalorder %s814_s0, %s645_s16  ;;  %s17_s13 = int_to_ptr.vmem [resolvable:$true] %s16_s13 }
   0x4   :  { %p649_p1 = scmp.lt.u32.totalorder %s645_s16, %s814_s0 }
   0x6   :  { %p651_p2 = pnand %p649_p1, %p646_p0 }
   0x8   :  { %654 = shalt.err (!%p651_p2)
}
   0x9   :  { %s655_s21 = scalar_lea.vmem %s17_s13, 512  ;;  %p660_p4 = scmp.lt.s32.totalorder %s17_s13, %s17_s13 }
   0xa   :  { %p656_p3 = scmp.ne.s32.totalorder %s17_s13, %s655_s21  ;;  %p661_p5 = scmp.lt.s32.totalorder %s655_s21, %s655_s21 }
   0xc   :  { %p662_p6 = por %p661_p5, %p660_p4 }
   0xe   :  { %p663_p7 = pnand %p662_p6, %p656_p3 }
  0x10   :  { %666 = shalt.err (!%p663_p7)
}
  0x11   :  { %s718_s22 = smov 64   ;;  %s719_s23 = smov 4  }
  0x12   :  { %22 = dma.hbm_to_vmem [thread:$0]  %s814_s0, 512, %s17_s13, [#allocation3], %s718_s22, %s718_s22, %s719_s23  }
  0x13   :  { %s720_s26 = smov [#allocation5]   ;;  %s667_s30 = scalar_lea.hbm %s815_s1, 3072 }
  0x14   :  { %s28_s27 = sshll.u32 %s720_s26, 4  ;;  %p668_p8 = scmp.ne.s32.totalorder %s815_s1, %s667_s30  ;;  %s29_s27 = int_to_ptr.vmem [resolvable:$true] %s28_s27 }
  0x15   :  { %p671_p9 = scmp.lt.u32.totalorder %s667_s30, %s815_s1 }
  0x17   :  { %p673_p10 = pnand %p671_p9, %p668_p8 }
  0x19   :  { %676 = shalt.err (!%p673_p10)
}
  0x1a   :  { %s677_s8 = scalar_lea.vmem %s29_s27, 3072  ;;  %p682_p12 = scmp.lt.s32.totalorder %s29_s27, %s29_s27 }
  0x1b   :  { %p678_p11 = scmp.ne.s32.totalorder %s29_s27, %s677_s8  ;;  %p683_p13 = scmp.lt.s32.totalorder %s677_s8, %s677_s8 }
  0x1d   :  { %p684_p0 = por %p683_p13, %p682_p12 }
  0x1f   :  { %p685_p1 = pnand %p684_p0, %p678_p11 }
  0x21   :  { %688 = shalt.err (!%p685_p1)
}
  0x22   :  { %s721_s0 = smov 192   ;;  %s722_s9 = smov 12  }
  0x23   :  { %34 = dma.hbm_to_vmem [thread:$0]  %s815_s1, 3072, %s29_s27, [#allocation6], %s721_s0, %s721_s0, %s722_s9  }
  0x24   :  { %711 = dma.done.wait [#allocation3], 512  }
  0x25   :  { %712 = vsyncadd [#allocation3], 4294966784 }
  0x26   :  { %713 = dma.done.wait [#allocation6], 3072  }
  0x27   :  { %714 = vsyncadd [#allocation6], 4294964224  ;;  %v723_v0 = vmov 0   ;;  %v609_v1 = vld [vmem:[#allocation5 + $0x4] ss:$12 sps:$4 sm:$0xff]   ;;  %v641_v26 = vld [vmem:[#allocation2 + $0x8] sm:$0xff]   ;;  %v86_v29 = vlaneseq }
  0x28   :  { %285 = vmatprep.mubr.bf16.mxu0 %v723_v0  ;;  %v611_v2 = vld [vmem:[#allocation5] ss:$12 sps:$4 sm:$0xff]   ;;  %253 = vmatprep.subr.bf16.mxu0 %v609_v1  ;;  %v612_v3 = vld [vmem:[#allocation5 + $0x1c] ss:$12 sps:$4 sm:$0xff]   ;;  %v614_v4 = vld [vmem:[#allocation5 + $0x18] ss:$12 sps:$4 sm:$0xff]  }
  0x29   :  { %254 = vmatpush1.bf16.msra.mxu0 %v611_v2  ;;  %v615_v5 = vld [vmem:[#allocation5 + $0x34] ss:$12 sps:$4 sm:$0xff]   ;;  %v617_v7 = vld [vmem:[#allocation5 + $0x30] ss:$12 sps:$4 sm:$0xff]   ;;  %v618_v8 = vld [vmem:[#allocation5 + $0x4c] ss:$12 sps:$4 sm:$0xff]  }
  0x2a   :  { %255 = vmatprep.subr.bf16.mxu0 %v612_v3  ;;  %v621_v6 = vld [vmem:[#allocation5 + $0x8] ss:$12 sps:$4 sm:$0xff]   ;;  %v625_v9 = vld [vmem:[#allocation5 + $0x20] ss:$12 sps:$4 sm:$0xff]   ;;  %v629_v10 = vld [vmem:[#allocation5 + $0x38] ss:$12 sps:$4 sm:$0xff]  }
  0x2b   :  { %577 = vmatprep.subr.bf16.mxu1 %v621_v6  ;;  %v620_v11 = vld [vmem:[#allocation5 + $0x48] ss:$12 sps:$4 sm:$0xff]   ;;  %v622_v12 = vld [vmem:[#allocation5 + $0x64] ss:$12 sps:$4 sm:$0xff]   ;;  %v624_v13 = vld [vmem:[#allocation5 + $0x60] ss:$12 sps:$4 sm:$0xff]  }
  0x2c   :  { %578 = vmatpush3.bf16.msra.mxu1 %v621_v6  ;;  %v633_v14 = vld [vmem:[#allocation5 + $0x50] ss:$12 sps:$4 sm:$0xff]   ;;  %v638_v16 = vld [vmem:[#allocation2] sm:$0xff]   ;;  %v637_v17 = vld [vmem:[#allocation5 + $0x68] ss:$12 sps:$4 sm:$0xff]   ;;  %v87_v30 = vshrl.u32 %v86_v29, 7 }
  0x2d   :  { %256 = vmatpush1.bf16.msra.mxu0 %v614_v4  ;;  %579 = vmatprep.subr.bf16.mxu1 %v625_v9  ;;  %v626_v15 = vld [vmem:[#allocation5 + $0x7c] ss:$12 sps:$4 sm:$0xff]   ;;  %v628_v18 = vld [vmem:[#allocation5 + $0x78] ss:$12 sps:$4 sm:$0xff]   ;;  %v630_v19 = vld [vmem:[#allocation5 + $0x94] ss:$12 sps:$4 sm:$0xff]  }
  0x2e   :  { %257 = vmatprep.subr.bf16.mxu0 %v615_v5  ;;  %593 = vmatprep.mubr.bf16.mxu1 %v638_v16  ;;  %v639_v20 = vld [vmem:[#allocation5 + $0x80] ss:$12 sps:$4 sm:$0xff]   ;;  %v632_v21 = vld [vmem:[#allocation5 + $0x90] ss:$12 sps:$4 sm:$0xff]   ;;  %v640_v23 = vld [vmem:[#allocation5 + $0x98] ss:$12 sps:$4 sm:$0xff]  }
  0x2f   :  { %v634_v22 = vld [vmem:[#allocation5 + $0xac] ss:$12 sps:$4 sm:$0xff]   ;;  %v636_v24 = vld [vmem:[#allocation5 + $0xa8] ss:$12 sps:$4 sm:$0xff]   ;;  %v642_v25 = vld [vmem:[#allocation5 + $0xb0] ss:$12 sps:$4 sm:$0xff]  }
  0x30   :  { %580 = vmatpush3.bf16.msra.mxu1 %v625_v9  ;;  %v643_v27 = vld [vmem:[#allocation2 + $0x10] sm:$0xff]   ;;  %v644_v28 = vld [vmem:[#allocation2 + $0x18] sm:$0xff]   ;;  %v88_v31 = vsub.s32 0, %v87_v30  ;;  %v84_v32 = vld [vmem:[%s816_s2] sm:$0x7]  ;;  %v92_v33 = vsub.s32 1, %v87_v30 }
  0x31   :  { %258 = vmatpush1.bf16.msra.mxu0 %v617_v7  ;;  %581 = vmatprep.subr.bf16.mxu1 %v629_v10  ;;  %v96_v36 = vsub.s32 2, %v87_v30  ;;  %s724_s2 = smov [#allocation7]  }
  0x32   :  { %259 = vmatprep.subr.bf16.mxu0 %v618_v8  ;;  %v779_v34 = vrot.slane %v84_v32, %v88_v31  ;;  %v781_v35 = vrot.slane %v84_v32, %v92_v33  ;;  %s492_s13 = sshll.u32 %s724_s2, 4  ;;  %s493_s13 = int_to_ptr.vmem [resolvable:$true] %s492_s13 }
  0x33   :  { %v97_v44 = vrot.slane %v84_v32, %v96_v36  ;;  %s689_s14 = scalar_lea.vmem %s493_s13, 1536  ;;  %p694_p3 = scmp.lt.s32.totalorder %s493_s13, %s493_s13 }
  0x34   :  { %582 = vmatpush3.bf16.msra.mxu1 %v629_v10  ;;  %p690_p2 = scmp.ne.s32.totalorder %s493_s13, %s689_s14  ;;  %p695_p4 = scmp.lt.s32.totalorder %s689_s14, %s689_s14 }
  0x35   :  { %260 = vmatpush1.bf16.msra.mxu0 %v620_v11  ;;  %583 = vmatprep.subr.bf16.mxu1 %v633_v14 }
  0x36   :  { %261 = vmatprep.subr.bf16.mxu0 %v622_v12  ;;  %p696_p5 = por %p695_p4, %p694_p3 }
  0x38   :  { %584 = vmatpush3.bf16.msra.mxu1 %v633_v14  ;;  %p697_p6 = pnand %p696_p5, %p690_p2 }
  0x39   :  { %262 = vmatpush1.bf16.msra.mxu0 %v624_v13  ;;  %585 = vmatprep.subr.bf16.mxu1 %v637_v17 }
  0x3a   :  { %263 = vmatprep.subr.bf16.mxu0 %v626_v15 }
  0x3c   :  { %586 = vmatpush3.bf16.msra.mxu1 %v637_v17 }
  0x3d   :  { %264 = vmatpush1.bf16.msra.mxu0 %v628_v18  ;;  %587 = vmatprep.subr.bf16.mxu1 %v639_v20 }
  0x3e   :  { %265 = vmatprep.subr.bf16.mxu0 %v630_v19 }
  0x40   :  { %588 = vmatpush3.bf16.msra.mxu1 %v639_v20 }
  0x41   :  { %266 = vmatpush1.bf16.msra.mxu0 %v632_v21  ;;  %589 = vmatprep.subr.bf16.mxu1 %v640_v23 }
  0x42   :  { %267 = vmatprep.subr.bf16.mxu0 %v634_v22 }
  0x44   :  { %590 = vmatpush3.bf16.msra.mxu1 %v640_v23 }
  0x45   :  { %268 = vmatpush1.bf16.msra.mxu0 %v636_v24  ;;  %591 = vmatprep.subr.bf16.mxu1 %v642_v25 }
  0x48   :  { %286 = vmatmul.mubr.bf16.vlgmr.msra.gmra.mrb[0].mxu0 %v638_v16  ;;  %592 = vmatpush3.bf16.msra.mxu1 %v642_v25 }
  0x49   :  { %295 = vmatprep.mubr.bf16.mxu0 %v723_v0 }
  0x4b   :  { %594 = vmatmul.mubr.bf16.vlgmr.msra.gmra.mrb[0].mxu1 %v641_v26 }
  0x4c   :  { %597 = vmatprep.mubr.bf16.mxu1 %v643_v27 }
  0x50   :  { %296 = vmatmul.mubr.bf16.gmra.mrb[4].mxu0 %v641_v26 }
  0x51   :  { %305 = vmatprep.mubr.bf16.mxu0 %v723_v0 }
  0x53   :  { %598 = vmatmul.mubr.bf16.gmra.mrb[4].mxu1 %v644_v28 }
  0x58   :  { %306 = vmatmul.mubr.bf16.gmra.mrb[8].mxu0 %v643_v27 }
  0x59   :  { %315 = vmatprep.mubr.bf16.mxu0 %v723_v0 }
  0x60   :  { %316 = vmatmul.mubr.bf16.gmra.mrb[12].mxu0 %v644_v28 }
 0x11b   :  { %v287_v37 = vpop.f32.mrb[0].mxu0 }
 0x11c   :  { %v288_v38 = vadd.f32 %v287_v37, %v779_v34  ;;  %v289_v39 = vpop.f32.mrb[1].mxu0 }
 0x11d   :  { %v290_v40 = vadd.f32 %v289_v39, %v781_v35  ;;  %v291_v41 = vpop.f32.mrb[2].mxu0 }
 0x11e   :  { %v292_v42 = vadd.f32 %v291_v41, %v779_v34  ;;  %v293_v43 = vpop.f32.mrb[3].mxu0  ;;  %v595_v48 = vpop.f32.mrb[0].mxu1 }
 0x11f   :  { %v549_v45 = vpack.c.bf16 %v290_v40, %v288_v38  ;;  %v294_v46 = vadd.f32 %v293_v43, %v781_v35  ;;  %v369_v49 = vadd.f32 %v595_v48, %v97_v44  ;;  %v360_v50 = vpop.f32.mrb[1].mxu1 }
 0x120   :  { %v361_v52 = vadd.f32 %v360_v50, %v97_v44  ;;  %v596_v53 = vpop.f32.mrb[2].mxu1 }
 0x121   :  { %471 = vst [vmem:[#allocation7] sm:$0xff] %v549_v45  ;;  %v551_v47 = vpack.c.bf16 %v294_v46, %v292_v42  ;;  %v554_v56 = vpack.c.bf16 %v369_v49, %v369_v49  ;;  %v372_v57 = vadd.f32 %v596_v53, %v97_v44  ;;  %v363_v58 = vpop.f32.mrb[3].mxu1 }
 0x122   :  { %v550_v61 = vpack.c.bf16 %v361_v52, %v361_v52  ;;  %v364_v62 = vadd.f32 %v363_v58, %v97_v44 }
 0x123   :  { %473 = vst [vmem:[#allocation7 + $0xc] sm:$0xff] %v551_v47  ;;  %v297_v51 = vpop.f32.mrb[4].mxu0  ;;  %476 = vst [vmem:[#allocation7 + $0x20] sm:$0xf] %v554_v56  ;;  %v556_v1 = vpack.c.bf16 %v372_v57, %v372_v57 }
 0x124   :  { %v298_v54 = vadd.f32 %v297_v51, %v779_v34  ;;  %v299_v55 = vpop.f32.mrb[5].mxu0  ;;  %472 = vst [vmem:[#allocation7 + $0x8] sm:$0xf] %v550_v61  ;;  %v552_v4 = vpack.c.bf16 %v364_v62, %v364_v62 }
 0x125   :  { %v300_v59 = vadd.f32 %v299_v55, %v781_v35  ;;  %v301_v60 = vpop.f32.mrb[6].mxu0  ;;  %478 = vst [vmem:[#allocation7 + $0x2c] sm:$0xf] %v556_v1 }
 0x126   :  { %v302_v63 = vadd.f32 %v301_v60, %v779_v34  ;;  %v303_v0 = vpop.f32.mrb[7].mxu0  ;;  %474 = vst [vmem:[#allocation7 + $0x14] sm:$0xf] %v552_v4  ;;  %v599_v6 = vpop.f32.mrb[4].mxu1 }
 0x127   :  { %v553_v2 = vpack.c.bf16 %v300_v59, %v298_v54  ;;  %v304_v3 = vadd.f32 %v303_v0, %v781_v35  ;;  %v385_v7 = vadd.f32 %v599_v6, %v97_v44  ;;  %v376_v8 = vpop.f32.mrb[5].mxu1 }
 0x128   :  { %v377_v10 = vadd.f32 %v376_v8, %v97_v44  ;;  %v600_v11 = vpop.f32.mrb[6].mxu1 }
 0x129   :  { %475 = vst [vmem:[#allocation7 + $0x18] sm:$0xff] %v553_v2  ;;  %v555_v5 = vpack.c.bf16 %v304_v3, %v302_v63  ;;  %v562_v14 = vpack.c.bf16 %v385_v7, %v385_v7  ;;  %v388_v15 = vadd.f32 %v600_v11, %v97_v44  ;;  %v379_v16 = vpop.f32.mrb[7].mxu1 }
 0x12a   :  { %v558_v19 = vpack.c.bf16 %v377_v10, %v377_v10  ;;  %v380_v20 = vadd.f32 %v379_v16, %v97_v44 }
 0x12b   :  { %477 = vst [vmem:[#allocation7 + $0x24] sm:$0xff] %v555_v5  ;;  %v307_v9 = vpop.f32.mrb[8].mxu0  ;;  %484 = vst [vmem:[#allocation7 + $0x50] sm:$0xf] %v562_v14  ;;  %v564_v23 = vpack.c.bf16 %v388_v15, %v388_v15 }
 0x12c   :  { %v308_v12 = vadd.f32 %v307_v9, %v779_v34  ;;  %v309_v13 = vpop.f32.mrb[9].mxu0  ;;  %480 = vst [vmem:[#allocation7 + $0x38] sm:$0xf] %v558_v19  ;;  %v560_v26 = vpack.c.bf16 %v380_v20, %v380_v20 }
 0x12d   :  { %v310_v17 = vadd.f32 %v309_v13, %v781_v35  ;;  %v311_v18 = vpop.f32.mrb[10].mxu0  ;;  %486 = vst [vmem:[#allocation7 + $0x5c] sm:$0xf] %v564_v23 }
 0x12e   :  { %v312_v21 = vadd.f32 %v311_v18, %v779_v34  ;;  %v313_v22 = vpop.f32.mrb[11].mxu0  ;;  %482 = vst [vmem:[#allocation7 + $0x44] sm:$0xf] %v560_v26 }
 0x12f   :  { %v557_v24 = vpack.c.bf16 %v310_v17, %v308_v12  ;;  %v314_v25 = vadd.f32 %v313_v22, %v781_v35 }
 0x131   :  { %479 = vst [vmem:[#allocation7 + $0x30] sm:$0xff] %v557_v24  ;;  %v559_v27 = vpack.c.bf16 %v314_v25, %v312_v21 }
 0x133   :  { %481 = vst [vmem:[#allocation7 + $0x3c] sm:$0xff] %v559_v27  ;;  %v317_v28 = vpop.f32.mrb[12].mxu0 }
 0x134   :  { %v318_v29 = vadd.f32 %v317_v28, %v779_v34  ;;  %v319_v30 = vpop.f32.mrb[13].mxu0 }
 0x135   :  { %v320_v31 = vadd.f32 %v319_v30, %v781_v35  ;;  %v321_v32 = vpop.f32.mrb[14].mxu0 }
 0x136   :  { %v322_v33 = vadd.f32 %v321_v32, %v779_v34  ;;  %v323_v36 = vpop.f32.mrb[15].mxu0 }
 0x137   :  { %v561_v37 = vpack.c.bf16 %v320_v31, %v318_v29  ;;  %v324_v38 = vadd.f32 %v323_v36, %v781_v35 }
 0x139   :  { %483 = vst [vmem:[#allocation7 + $0x48] sm:$0xff] %v561_v37  ;;  %v563_v39 = vpack.c.bf16 %v324_v38, %v322_v33 }
 0x13b   :  { %485 = vst [vmem:[#allocation7 + $0x54] sm:$0xff] %v563_v39 }
 0x13c   :  { %700 = shalt.err (!%p697_p6)
}
 0x13d   :  { %s701_s17 = scalar_lea.hbm %s817_s3, 1536 }
 0x13e   :  { %p702_p7 = scmp.ne.s32.totalorder %s817_s3, %s701_s17  ;;  %p705_p8 = scmp.lt.u32.totalorder %s701_s17, %s817_s3 }
 0x140   :  { %p707_p9 = pnand %p705_p8, %p702_p7 }
 0x142   :  { %710 = shalt.err (!%p707_p9)
}
 0x143   :  { %498 = dma.vmem_to_hbm [thread:$0]  %s493_s13, 1536, %s817_s3, [#allocation4], %s721_s0, %s721_s0, %s722_s9  }
 0x144   :  { %715 = dma.done.wait [#allocation4], 1536  }
 0x145   :  { %716 = vsyncadd [#allocation4], 4294965760 }
 0x146   :  { %502 = vsyncpa [#allocation3], 1 }
 0x147   :  { %503 = vsyncpa [#allocation6], 1 }
 0x148   :  { %504 = vsyncpa [#allocation4], 1 }

</bundles_post_ra>
